<compile_context>
chip_gen: v7x
topology: tpu7x:2x2x1
jax: 0.10.0
libtpu: 0.0.40
codegen_flags: <defaults>
</compile_context>

<pallas_src>
import jax
import jax.numpy as jnp
from jax.experimental import pallas as pl
from jax.experimental.pallas import tpu as pltpu


_LN_EPS = 1e-5


def _round_up(a, b):
    return ((a + b - 1) // b) * b


def _vmem_capacity_bytes():
    """Physical VMEM of the current chip generation; conservative fallback."""
    try:
        return int(pltpu.get_tpu_info().vmem_capacity_bytes)
    except Exception:
        return 64 * 1024 * 1024  # v7x-sized fallback: safe on every generation


def _footprint_bytes(TM, TF, D, F, xbytes, obytes):
    """Rough VMEM footprint for one (TM, TF) tiling choice, incl. buffering + temporaries."""
    n_f_chunks = F // TF
    wbuf = 1 if n_f_chunks == 1 else 2          # constant-index weights are single-buffered
    b = 0
    b += 2 * TM * D * xbytes                    # x tile, double-buffered
    b += 2 * TM * D * obytes                    # out tile, double-buffered
    b += 3 * D * 4                              # gamma / beta / b2 (single-buffered, f32)
    b += wbuf * 2 * D * TF * 2                  # w1 + w2 chunks (bf16)
    b += wbuf * TF * 4                          # b1 chunk (f32)
    b += TM * D * 4 + TM * D * 2                # acc (f32) + cached LN output (bf16) scratch
    b += TM * TF * 4 + TM * TF * 2              # hidden f32 + bf16 copy (compute temporaries)
    b += 2 * TM * D * 4                         # LayerNorm f32 temporaries / headroom
    return b


def _choose_tiles(N, D, F, xbytes, obytes, vmem_budget):
    """Pick (TM, TF): largest row tile (multiple of 256 where possible, MXU height) and
    largest F-chunk (multiple of 128 dividing F) whose footprint fits the VMEM budget."""
    tm_cands = [t for t in (512, 256, 128, 64, 32, 16, 8) if t <= _round_up(N, 8)]
    if not tm_cands:
        tm_cands = [8]
    tf_cands = [F] + [c for c in (4096, 2048, 1024, 512, 256, 128)
                      if c < F and F % c == 0]
    for TM in tm_cands:
        for TF in tf_cands:
            if _footprint_bytes(TM, TF, D, F, xbytes, obytes) <= vmem_budget:
                return TM, TF
    return tm_cands[-1], tf_cands[-1]           # last resort (smallest tiles)


def ffn_kernel(x_ref, gamma_ref, beta_ref, w1_ref, b1_ref, w2_ref, b2_ref,
               o_ref, acc_ref, xn_ref):
    # x_ref:  (TM, D)            gamma/beta/b2: (1, D) f32      b1: (1, TF) f32
    # w1: (D, TF) bf16           w2: (TF, D) bf16               o_ref: (TM, D)
    # acc_ref: (TM, D) f32 scratch (partial sums over F-chunks)
    # xn_ref:  (TM, D) bf16 scratch (cached LayerNorm output)
    k = pl.program_id(1)

    @pl.when(k == 0)
    def _():
        # LayerNorm over the feature axis, f32 statistics (torch: biased var, eps=1e-5).
        x = x_ref[...].astype(jnp.float32)
        mean = jnp.mean(x, axis=-1, keepdims=True)
        xc = x - mean
        var = jnp.mean(xc * xc, axis=-1, keepdims=True)
        xn = (xc * jax.lax.rsqrt(var + _LN_EPS)) * gamma_ref[...] + beta_ref[...]
        xn_ref[...] = xn.astype(xn_ref.dtype)     # cache bf16 LN output across F-chunks
        acc_ref[...] = jnp.zeros_like(acc_ref)

    # Linear 1 chunk (D -> TF): bf16 operands, f32 MXU accumulation, + bias, ReLU.
    h = jnp.dot(xn_ref[...], w1_ref[...], preferred_element_type=jnp.float32)
    h = jnp.maximum(h + b1_ref[...], 0.0)
    # Dropout: identity (eval/inference mode).

    # Linear 2 chunk (TF -> D): accumulate partial products over F-chunks in f32.
    acc_ref[...] += jnp.dot(h.astype(jnp.bfloat16), w2_ref[...],
                            preferred_element_type=jnp.float32)

    @pl.when(k == pl.num_programs(1) - 1)
    def _():
        o_ref[...] = (acc_ref[...] + b2_ref[...]).astype(o_ref.dtype)


def feed_forward(x, gamma, beta, w1, b1, w2, b2):
    """Conformer FeedForward forward pass.  x: [B, T, D] -> [B, T, D].

    Token activations may be f32 or bf16 (output dtype == input dtype); LayerNorm
    statistics are always f32.  For best performance store w1/w2 in bf16 (see
    init_params) and use a d_model that is a multiple of 128 (lane-dense I/O).
    """
    B, T, D = x.shape
    F = w1.shape[1]
    N = B * T
    x2 = x.reshape(N, D)

    # Weights to bf16 only if not already stored that way (avoid a per-call HBM pass).
    w1_bf = w1 if w1.dtype == jnp.bfloat16 else w1.astype(jnp.bfloat16)
    w2_bf = w2 if w2.dtype == jnp.bfloat16 else w2.astype(jnp.bfloat16)
    gamma_f = gamma.reshape(1, D).astype(jnp.float32)
    beta_f = beta.reshape(1, D).astype(jnp.float32)
    b1_f = b1.reshape(1, F).astype(jnp.float32)
    b2_f = b2.reshape(1, D).astype(jnp.float32)

    xbytes = x2.dtype.itemsize
    obytes = xbytes

    # Generation-aware VMEM budget (v5e/v6e: 128 MiB physical, v7x: 64 MiB).
    vmem_capacity = _vmem_capacity_bytes()
    vmem_limit = min(vmem_capacity, max(32 * 1024 * 1024, int(0.85 * vmem_capacity)))

    TM, TF = _choose_tiles(N, D, F, xbytes, obytes, int(0.9 * vmem_limit))
    N_pad = _round_up(N, TM)
    if N_pad != N:
        x2 = jnp.pad(x2, ((0, N_pad - N), (0, 0)))
    n_row_tiles = N_pad // TM
    n_f_chunks = F // TF
    grid = (n_row_tiles, n_f_chunks)

    # Constant-index operands: single buffer (2nd pipeline buffer would be pure waste).
    const_buf = pl.Buffered(1)
    if n_f_chunks == 1:
        # Full weights fit: keep them VMEM-resident, single-buffered.
        w1_spec = pl.BlockSpec((D, F), lambda i, k: (0, 0), pipeline_mode=const_buf)
        b1_spec = pl.BlockSpec((1, F), lambda i, k: (0, 0), pipeline_mode=const_buf)
        w2_spec = pl.BlockSpec((F, D), lambda i, k: (0, 0), pipeline_mode=const_buf)
    else:
        # F-chunked: stream weight chunks (double-buffered by default) along axis k.
        w1_spec = pl.BlockSpec((D, TF), lambda i, k: (0, k))
        b1_spec = pl.BlockSpec((1, TF), lambda i, k: (0, k))
        w2_spec = pl.BlockSpec((TF, D), lambda i, k: (k, 0))

    in_specs = [
        pl.BlockSpec((TM, D), lambda i, k: (i, 0)),                          # x tile
        pl.BlockSpec((1, D), lambda i, k: (0, 0), pipeline_mode=const_buf),  # gamma
        pl.BlockSpec((1, D), lambda i, k: (0, 0), pipeline_mode=const_buf),  # beta
        w1_spec,
        b1_spec,
        w2_spec,
        pl.BlockSpec((1, D), lambda i, k: (0, 0), pipeline_mode=const_buf),  # b2
    ]

    cost = pl.CostEstimate(
        flops=4 * N_pad * D * F,                  # two matmuls, 2 flops per MAC
        transcendentals=N_pad,                    # one rsqrt per token row
        bytes_accessed=(2 * N_pad * D * xbytes    # x in + out
                        + 2 * D * F * 2           # bf16 weights
                        + (3 * D + F) * 4),       # LN params + biases
    )

    out = pl.pallas_call(
        ffn_kernel,
        out_shape=jax.ShapeDtypeStruct((N_pad, D), x.dtype),
        grid=grid,
        in_specs=in_specs,
        out_specs=pl.BlockSpec((TM, D), lambda i, k: (i, 0)),
        scratch_shapes=[
            pltpu.VMEM((TM, D), jnp.float32),     # f32 accumulator across F-chunks
            pltpu.VMEM((TM, D), jnp.bfloat16),    # cached LayerNorm output (bf16)
        ],
        compiler_params=pltpu.CompilerParams(
            dimension_semantics=("parallel", "arbitrary"),
            vmem_limit_bytes=vmem_limit,
        ),
        cost_estimate=cost,
    )(x2, gamma_f, beta_f, w1_bf, b1_f, w2_bf, b2_f)

    return out[:N].reshape(B, T, D)


def init_params(key, d_model, ff_mult=4):
    F = ff_mult * d_model
    k1, k2, k3, k4 = jax.random.split(key, 4)
    # LayerNorm: gamma=1, beta=0 (torch default init)
    gamma = jnp.ones((1, d_model), jnp.float32)
    beta = jnp.zeros((1, d_model), jnp.float32)
    # Linear layers: uniform(-1/sqrt(fan_in), 1/sqrt(fan_in)) like torch default.
    # Weights stored in bf16 (MXU-native path; avoids a per-call cast / extra HBM pass).
    lim1 = 1.0 / (d_model ** 0.5)
    w1 = jax.random.uniform(k1, (d_model, F), jnp.float32, -lim1, lim1).astype(jnp.bfloat16)
    b1 = jax.random.uniform(k2, (1, F), jnp.float32, -lim1, lim1)
    lim2 = 1.0 / (F ** 0.5)
    w2 = jax.random.uniform(k3, (F, d_model), jnp.float32, -lim2, lim2).astype(jnp.bfloat16)
    b2 = jax.random.uniform(k4, (1, d_model), jnp.float32, -lim2, lim2)
    return gamma, beta, w1, b1, w2, b2


def reference(x, gamma, beta, w1, b1, w2, b2):
    # Mirrors the kernel numerics: f32 LayerNorm stats, bf16 matmul operands, f32 accumulation.
    xf = x.astype(jnp.float32)
    mean = jnp.mean(xf, axis=-1, keepdims=True)
    var = jnp.mean((xf - mean) ** 2, axis=-1, keepdims=True)
    xn = (xf - mean) * jax.lax.rsqrt(var + _LN_EPS) * gamma.reshape(-1) + beta.reshape(-1)
    h = jnp.dot(xn.astype(jnp.bfloat16), w1.astype(jnp.bfloat16),
                preferred_element_type=jnp.float32) + b1.reshape(-1)
    h = jnp.maximum(h, 0.0)
    y = jnp.dot(h.astype(jnp.bfloat16), w2.astype(jnp.bfloat16),
                preferred_element_type=jnp.float32) + b2.reshape(-1)
    return y.astype(x.dtype)


if __name__ == "__main__":
    # Small correctness shapes (realistic d_model should be a multiple of 128 for
    # lane-dense loads/stores; D=32 here is correctness-only, not a benchmark).
    B, T, D = 2, 8, 32  # batch=2, seq=8, d_model=32, ff hidden = 128
    key = jax.random.PRNGKey(0)
    kx, kp = jax.random.split(key)
    x = jax.random.normal(kx, (B, T, D), jnp.float32)
    params = init_params(kp, D, ff_mult=4)

    out = feed_forward(x, *params)
    out = jax.block_until_ready(out)

    ref = reference(x, *params)
    assert out.shape == (B, T, D)
    err = float(jnp.max(jnp.abs(out - ref)))
    assert jnp.allclose(out, ref, atol=2e-2, rtol=2e-2), err
    print("KERNEL_OK")
</pallas_src>

<mosaic_0001>
module attributes {stable_mosaic.version = 11 : i64} {
  func.func @ffn_kernel(%arg0: i32, %arg1: i32, %arg2: memref<16x32xf32, #tpu.memory_space<vmem>>, %arg3: memref<1x32xf32, #tpu.memory_space<vmem>>, %arg4: memref<1x32xf32, #tpu.memory_space<vmem>>, %arg5: memref<32x128xbf16, #tpu.memory_space<vmem>>, %arg6: memref<1x128xf32, #tpu.memory_space<vmem>>, %arg7: memref<128x32xbf16, #tpu.memory_space<vmem>>, %arg8: memref<1x32xf32, #tpu.memory_space<vmem>>, %arg9: memref<16x32xf32, #tpu.memory_space<vmem>>, %arg10: memref<16x32xf32, #tpu.memory_space<vmem>>, %arg11: memref<16x32xbf16, #tpu.memory_space<vmem>>) attributes {dimension_semantics = [#tpu.dimension_semantics<parallel>, #tpu.dimension_semantics<arbitrary>], iteration_bounds = array<i64: 1, 1>, scalar_prefetch = 0 : i64, scratch_operands = 2 : i64, tpu.core_type = #tpu.core_type<tc>, window_params = [{transform_indices = @transform_0, window_bounds = array<i64: 16, 32>}, {pipeline_mode = #tpu.pipeline_mode<synchronous>, transform_indices = @transform_1, window_bounds = array<i64: 1, 32>}, {pipeline_mode = #tpu.pipeline_mode<synchronous>, transform_indices = @transform_2, window_bounds = array<i64: 1, 32>}, {pipeline_mode = #tpu.pipeline_mode<synchronous>, transform_indices = @transform_3, window_bounds = array<i64: 32, 128>}, {pipeline_mode = #tpu.pipeline_mode<synchronous>, transform_indices = @transform_4, window_bounds = array<i64: 1, 128>}, {pipeline_mode = #tpu.pipeline_mode<synchronous>, transform_indices = @transform_5, window_bounds = array<i64: 128, 32>}, {pipeline_mode = #tpu.pipeline_mode<synchronous>, transform_indices = @transform_6, window_bounds = array<i64: 1, 32>}, {transform_indices = @transform_7, window_bounds = array<i64: 16, 32>}]} {
    %c0_i32 = arith.constant 0 : i32
    %0 = arith.cmpi eq, %arg1, %c0_i32 : i32
    %1 = arith.extui %0 : i1 to i32
    %c0_i32_0 = arith.constant 0 : i32
    %2 = arith.cmpi ne, %1, %c0_i32_0 : i32
    scf.if %2 {
      %c0_16 = arith.constant 0 : index
      %c0_17 = arith.constant 0 : index
      %20 = vector.load %arg2[%c0_16, %c0_17] : memref<16x32xf32, #tpu.memory_space<vmem>>, vector<16x32xf32>
      %cst_18 = arith.constant dense<0.000000e+00> : vector<16xf32>
      %21 = vector.multi_reduction <add>, %20, %cst_18 [1] : vector<16x32xf32> to vector<16xf32>
      %22 = vector.shape_cast %21 : vector<16xf32> to vector<16x1xf32>
      %cst_19 = arith.constant 3.200000e+01 : f32
      %23 = vector.broadcast %cst_19 : f32 to vector<16x1xf32>
      %24 = arith.divf %22, %23 : vector<16x1xf32>
      %25 = vector.broadcast %24 : vector<16x1xf32> to vector<16x32xf32>
      %26 = arith.subf %20, %25 : vector<16x32xf32>
      %27 = arith.mulf %26, %26 : vector<16x32xf32>
      %cst_20 = arith.constant dense<0.000000e+00> : vector<16xf32>
      %28 = vector.multi_reduction <add>, %27, %cst_20 [1] : vector<16x32xf32> to vector<16xf32>
      %29 = vector.shape_cast %28 : vector<16xf32> to vector<16x1xf32>
      %cst_21 = arith.constant 3.200000e+01 : f32
      %30 = vector.broadcast %cst_21 : f32 to vector<16x1xf32>
      %31 = arith.divf %29, %30 : vector<16x1xf32>
      %cst_22 = arith.constant 9.99999974E-6 : f32
      %32 = vector.broadcast %cst_22 : f32 to vector<16x1xf32>
      %33 = arith.addf %31, %32 : vector<16x1xf32>
      %34 = math.rsqrt %33 : vector<16x1xf32>
      %35 = vector.broadcast %34 : vector<16x1xf32> to vector<16x32xf32>
      %36 = arith.mulf %26, %35 : vector<16x32xf32>
      %c0_23 = arith.constant 0 : index
      %c0_24 = arith.constant 0 : index
      %37 = vector.load %arg3[%c0_23, %c0_24] : memref<1x32xf32, #tpu.memory_space<vmem>>, vector<1x32xf32>
      %38 = vector.broadcast %37 : vector<1x32xf32> to vector<16x32xf32>
      %39 = arith.mulf %36, %38 : vector<16x32xf32>
      %c0_25 = arith.constant 0 : index
      %c0_26 = arith.constant 0 : index
      %40 = vector.load %arg4[%c0_25, %c0_26] : memref<1x32xf32, #tpu.memory_space<vmem>>, vector<1x32xf32>
      %41 = vector.broadcast %40 : vector<1x32xf32> to vector<16x32xf32>
      %42 = arith.addf %39, %41 : vector<16x32xf32>
      %43 = arith.truncf %42 : vector<16x32xf32> to vector<16x32xbf16>
      %c0_27 = arith.constant 0 : index
      %c0_28 = arith.constant 0 : index
      %44 = vector.load %arg11[%c0_27, %c0_28] : memref<16x32xbf16, #tpu.memory_space<vmem>>, vector<16x32xbf16>
      tpu.vector_store %arg11[%c0_27, %c0_28], %43 {strides = array<i32>} : memref<16x32xbf16, #tpu.memory_space<vmem>>, vector<16x32xbf16>,
      %cst_29 = arith.constant 0.000000e+00 : f32
      %45 = vector.broadcast %cst_29 : f32 to vector<16x32xf32>
      %c0_30 = arith.constant 0 : index
      %c0_31 = arith.constant 0 : index
      %46 = vector.load %arg10[%c0_30, %c0_31] : memref<16x32xf32, #tpu.memory_space<vmem>>, vector<16x32xf32>
      tpu.vector_store %arg10[%c0_30, %c0_31], %45 {strides = array<i32>} : memref<16x32xf32, #tpu.memory_space<vmem>>, vector<16x32xf32>,
    } else {
    }
    %c0 = arith.constant 0 : index
    %c0_1 = arith.constant 0 : index
    %3 = vector.load %arg11[%c0, %c0_1] : memref<16x32xbf16, #tpu.memory_space<vmem>>, vector<16x32xbf16>
    %c0_2 = arith.constant 0 : index
    %c0_3 = arith.constant 0 : index
    %4 = vector.load %arg5[%c0_2, %c0_3] : memref<32x128xbf16, #tpu.memory_space<vmem>>, vector<32x128xbf16>
    %cst = arith.constant dense<0.000000e+00> : vector<16x128xf32>
    %5 = tpu.matmul %3, %4, %cst {dimension_numbers = #tpu.dot_dimension_numbers<[1], [0], [0], [1], [0, 0, 1, 1], [], []>} : vector<16x32xbf16>, vector<32x128xbf16>, vector<16x128xf32> -> vector<16x128xf32>
    %c0_4 = arith.constant 0 : index
    %c0_5 = arith.constant 0 : index
    %6 = vector.load %arg6[%c0_4, %c0_5] : memref<1x128xf32, #tpu.memory_space<vmem>>, vector<1x128xf32>
    %7 = vector.broadcast %6 : vector<1x128xf32> to vector<16x128xf32>
    %8 = arith.addf %5, %7 : vector<16x128xf32>
    %cst_6 = arith.constant 0.000000e+00 : f32
    %9 = vector.broadcast %cst_6 : f32 to vector<16x128xf32>
    %10 = arith.maximumf %8, %9 : vector<16x128xf32>
    %c0_7 = arith.constant 0 : index
    %c0_8 = arith.constant 0 : index
    %11 = vector.load %arg10[%c0_7, %c0_8] : memref<16x32xf32, #tpu.memory_space<vmem>>, vector<16x32xf32>
    %12 = arith.truncf %10 : vector<16x128xf32> to vector<16x128xbf16>
    %c0_9 = arith.constant 0 : index
    %c0_10 = arith.constant 0 : index
    %13 = vector.load %arg7[%c0_9, %c0_10] : memref<128x32xbf16, #tpu.memory_space<vmem>>, vector<128x32xbf16>
    %cst_11 = arith.constant dense<0.000000e+00> : vector<16x32xf32>
    %14 = tpu.matmul %12, %13, %cst_11 {dimension_numbers = #tpu.dot_dimension_numbers<[1], [0], [0], [1], [0, 0, 1, 1], [], []>} : vector<16x128xbf16>, vector<128x32xbf16>, vector<16x32xf32> -> vector<16x32xf32>
    %15 = arith.addf %11, %14 : vector<16x32xf32>
    %c0_12 = arith.constant 0 : index
    %c0_13 = arith.constant 0 : index
    %16 = vector.load %arg10[%c0_12, %c0_13] : memref<16x32xf32, #tpu.memory_space<vmem>>, vector<16x32xf32>
    tpu.vector_store %arg10[%c0_12, %c0_13], %15 {strides = array<i32>} : memref<16x32xf32, #tpu.memory_space<vmem>>, vector<16x32xf32>,
    %c0_i32_14 = arith.constant 0 : i32
    %17 = arith.cmpi eq, %arg1, %c0_i32_14 : i32
    %18 = arith.extui %17 : i1 to i32
    %c0_i32_15 = arith.constant 0 : i32
    %19 = arith.cmpi ne, %18, %c0_i32_15 : i32
    scf.if %19 {
      %c0_16 = arith.constant 0 : index
      %c0_17 = arith.constant 0 : index
      %20 = vector.load %arg10[%c0_16, %c0_17] : memref<16x32xf32, #tpu.memory_space<vmem>>, vector<16x32xf32>
      %c0_18 = arith.constant 0 : index
      %c0_19 = arith.constant 0 : index
      %21 = vector.load %arg8[%c0_18, %c0_19] : memref<1x32xf32, #tpu.memory_space<vmem>>, vector<1x32xf32>
      %22 = vector.broadcast %21 : vector<1x32xf32> to vector<16x32xf32>
      %23 = arith.addf %20, %22 : vector<16x32xf32>
      %c0_20 = arith.constant 0 : index
      %c0_21 = arith.constant 0 : index
      %24 = vector.load %arg9[%c0_20, %c0_21] : memref<16x32xf32, #tpu.memory_space<vmem>>, vector<16x32xf32>
      tpu.vector_store %arg9[%c0_20, %c0_21], %23 {strides = array<i32>} : memref<16x32xf32, #tpu.memory_space<vmem>>, vector<16x32xf32>,
    } else {
    }
    return
  }
  func.func @transform_0(%arg0: i32, %arg1: i32) -> (i32, i32) {
    %c0_i32 = arith.constant 0 : i32
    %c0_i32_0 = arith.constant 0 : i32
    return %arg0, %c0_i32 : i32, i32
  }
  func.func @transform_1(%arg0: i32, %arg1: i32) -> (i32, i32) {
    %c0_i32 = arith.constant 0 : i32
    %c0_i32_0 = arith.constant 0 : i32
    %c0_i32_1 = arith.constant 0 : i32
    return %c0_i32, %c0_i32_0 : i32, i32
  }
  func.func @transform_2(%arg0: i32, %arg1: i32) -> (i32, i32) {
    %c0_i32 = arith.constant 0 : i32
    %c0_i32_0 = arith.constant 0 : i32
    %c0_i32_1 = arith.constant 0 : i32
    return %c0_i32, %c0_i32_0 : i32, i32
  }
  func.func @transform_3(%arg0: i32, %arg1: i32) -> (i32, i32) {
    %c0_i32 = arith.constant 0 : i32
    %c0_i32_0 = arith.constant 0 : i32
    %c0_i32_1 = arith.constant 0 : i32
    return %c0_i32, %c0_i32_0 : i32, i32
  }
  func.func @transform_4(%arg0: i32, %arg1: i32) -> (i32, i32) {
    %c0_i32 = arith.constant 0 : i32
    %c0_i32_0 = arith.constant 0 : i32
    %c0_i32_1 = arith.constant 0 : i32
    return %c0_i32, %c0_i32_0 : i32, i32
  }
  func.func @transform_5(%arg0: i32, %arg1: i32) -> (i32, i32) {
    %c0_i32 = arith.constant 0 : i32
    %c0_i32_0 = arith.constant 0 : i32
    %c0_i32_1 = arith.constant 0 : i32
    return %c0_i32, %c0_i32_0 : i32, i32
  }
  func.func @transform_6(%arg0: i32, %arg1: i32) -> (i32, i32) {
    %c0_i32 = arith.constant 0 : i32
    %c0_i32_0 = arith.constant 0 : i32
    %c0_i32_1 = arith.constant 0 : i32
    return %c0_i32, %c0_i32_0 : i32, i32
  }
  func.func @transform_7(%arg0: i32, %arg1: i32) -> (i32, i32) {
    %c0_i32 = arith.constant 0 : i32
    %c0_i32_0 = arith.constant 0 : i32
    return %arg0, %c0_i32 : i32, i32
  }
}

</mosaic_0001>

<bundles_post_ra>
// kernel: tpu_custom_call.1
= control target key start
LH: loop header
LB: loop body
LE: loop exit
PB: predicated region body
PF: predicated region fallthrough
CT: control target
= control target key end

     0   :  { %vm34_vm0 = vcmask 261120   ;;  %s514_s0 = inlined_call_operand.vmem [shape: f32[16,32], index: 0, kind: input, shape index: {}]   ;;  %s515_s1 = inlined_call_operand.vmem [shape: f32[1,32], index: 1, kind: input, shape index: {}]   ;;  %s516_s2 = inlined_call_operand.vmem [shape: f32[1,32], index: 2, kind: input, shape index: {}]   ;;  %s517_s3 = inlined_call_operand.vmem [shape: bf16[32,128], index: 3, kind: input, shape index: {}]   ;;  %s518_s4 = inlined_call_operand.vmem [shape: f32[1,128], index: 4, kind: input, shape index: {}]   ;;  %s519_s5 = inlined_call_operand.vmem [shape: bf16[128,32], index: 5, kind: input, shape index: {}]   ;;  %s520_s6 = inlined_call_operand.vmem [shape: f32[1,32], index: 6, kind: input, shape index: {}]   ;;  %s521_s7 = inlined_call_operand.hbm [shape: f32[16,32], index: 7, kind: output, shape index: {}]  }
   0x1   :  { %v32_v0 = vld [vmem:[%s514_s0] sm:$0xff]  ;;  %v33_v1 = vld [vmem:[%s514_s0 + $0x8] sm:$0xff] }
   0x2   :  { %v35_v2 = vsel %vm34_vm0, %v32_v0, 0.0  ;;  %v38_v3 = vsel %vm34_vm0, %v33_v1, 0.0 }
   0x3   :  { %36 = vadd.xlane.f32.xlu0 %v35_v2 }
   0x7   :  { %39 = vadd.xlane.f32.xlu0 %v38_v3 }
   0x8   :  { %12 = vsyncpa [#allocation5], 0  ;;  %v359_v14 = vld [vmem:[%s517_s3] sm:$0xff]   ;;  %v397_v15 = vmov 0.0   ;;  %v360_v16 = vld [vmem:[%s517_s3 + $0x8] sm:$0xff]   ;;  %vm398_vm1 = vmmov 0  }
   0x9   :  { %326 = vmatprep.subr.bf16.mxu0 %v397_v15  ;;  %82 = vst.msk [vmem:[#allocation2] sm:$0xff] %vm34_vm0, %v397_v15  ;;  %83 = vst.msk [vmem:[#allocation2 + $0x8] sm:$0xff] %vm34_vm0, %v397_v15  ;;  %334 = vmatprep.subr.bf16.mxu1 %v397_v15  ;;  %v361_v17 = vld [vmem:[%s519_s5] sm:$0xff]   ;;  %v362_v18 = vld [vmem:[%s519_s5 + $0x8] sm:$0xff]   ;;  %s399_s27 = smov [#allocation4]  }
   0xa   :  { %327 = vmatpush3.bf16.msra.mxu0 %v359_v14  ;;  %330 = vmatprep.mubr.msk.bf16.mxu0 %vm398_vm1, %v397_v15  ;;  %v363_v19 = vld [vmem:[%s519_s5 + $0x10] sm:$0xff]   ;;  %v364_v20 = vld [vmem:[%s519_s5 + $0x18] sm:$0xff]   ;;  %v365_v21 = vld [vmem:[%s519_s5 + $0x20] sm:$0xff]   ;;  %s288_s0 = sshll.u32 %s399_s27, 4  ;;  %s289_s0 = int_to_ptr.vmem [resolvable:$true] %s288_s0 }
   0xb   :  { %328 = vmatprep.subr.bf16.mxu0 %v397_v15  ;;  %350 = vmatprep.mubr.msk.bf16.mxu1 %vm398_vm1, %v397_v15  ;;  %v366_v22 = vld [vmem:[%s519_s5 + $0x28] sm:$0xff]   ;;  %v299_v31 = vld [vmem:[%s515_s1] ss:$0 sm:$0xff]  ;;  %v367_v41 = vld [vmem:[%s519_s5 + $0x30] sm:$0xff]   ;;  %s373_s28 = scalar_lea.vmem %s289_s0, 256  ;;  %p378_p1 = scmp.lt.s32.totalorder %s289_s0, %s289_s0 }
   0xc   :  { %335 = vmatpush3.bf16.msra.mxu1 %v361_v17  ;;  %v300_v35 = vld [vmem:[%s516_s2] ss:$0 sm:$0xff]  ;;  %v368_v42 = vld [vmem:[%s519_s5 + $0x38] sm:$0xff]   ;;  %p374_p0 = scmp.ne.s32.totalorder %s289_s0, %s373_s28  ;;  %p379_p2 = scmp.lt.s32.totalorder %s373_s28, %s373_s28 }
   0xd   :  { %336 = vmatprep.subr.bf16.mxu1 %v397_v15  ;;  %v301_v43 = vld [vmem:[%s518_s4] ss:$0 sm:$0xff] }
   0xe   :  { %329 = vmatpush3.bf16.msra.mxu0 %v360_v16  ;;  %v313_v61 = vld [vmem:[%s520_s6] ss:$0 sm:$0xff]  ;;  %p380_p3 = por %p379_p2, %p378_p1 }
  0x10   :  { %337 = vmatpush3.bf16.msra.mxu1 %v362_v18  ;;  %v155_v53 = vld [vmem:[#allocation2] sm:$0xff]  ;;  %v156_v55 = vld [vmem:[#allocation2 + $0x8] sm:$0xff]  ;;  %p381_p4 = pnand %p380_p3, %p374_p0 }
  0x11   :  { %338 = vmatprep.subr.bf16.mxu1 %v397_v15 }
  0x14   :  { %339 = vmatpush3.bf16.msra.mxu1 %v363_v19 }
  0x15   :  { %340 = vmatprep.subr.bf16.mxu1 %v397_v15 }
  0x18   :  { %341 = vmatpush3.bf16.msra.mxu1 %v364_v20 }
  0x19   :  { %342 = vmatprep.subr.bf16.mxu1 %v397_v15 }
  0x1c   :  { %343 = vmatpush3.bf16.msra.mxu1 %v365_v21 }
  0x1d   :  { %344 = vmatprep.subr.bf16.mxu1 %v397_v15 }
  0x20   :  { %345 = vmatpush3.bf16.msra.mxu1 %v366_v22 }
  0x21   :  { %346 = vmatprep.subr.bf16.mxu1 %v397_v15 }
  0x24   :  { %347 = vmatpush3.bf16.msra.mxu1 %v367_v41 }
  0x25   :  { %348 = vmatprep.subr.bf16.mxu1 %v397_v15 }
  0x28   :  { %349 = vmatpush3.bf16.msra.mxu1 %v368_v42 }
  0x90   :  { %v37_v4 = vpop.xlane.xlu0 %36 }
  0x91   :  { %v42_v5 = vmul.f32 0.03125, %v37_v4 }
  0x93   :  { %v44_v6 = vsub.f32 %v32_v0, %v42_v5 }
  0x94   :  { %v40_v7 = vpop.xlane.xlu0 %39 }
  0x95   :  { %v43_v8 = vmul.f32 0.03125, %v40_v7  ;;  %v46_v9 = vmul.f32 %v44_v6, %v44_v6 }
  0x97   :  { %v45_v10 = vsub.f32 %v33_v1, %v43_v8  ;;  %v48_v11 = vsel %vm34_vm0, %v46_v9, 0.0 }
  0x98   :  { %49 = vadd.xlane.f32.xlu1 %v48_v11 }
  0x99   :  { %v47_v12 = vmul.f32 %v45_v10, %v45_v10 }
  0x9b   :  { %v51_v13 = vsel %vm34_vm0, %v47_v12, 0.0 }
  0x9c   :  { %52 = vadd.xlane.f32.xlu1 %v51_v13 }
 0x125   :  { %v50_v23 = vpop.xlane.xlu1 %49 }
 0x126   :  { %v54_v24 = vmul.f32 0.03125, %v50_v23 }
 0x128   :  { %v56_v25 = vadd.f32 1e-05, %v54_v24 }
 0x129   :  { %v53_v26 = vpop.xlane.xlu1 %52 }
 0x12a   :  { %369 = vrsqrt.f32 %v56_v25  ;;  %v55_v27 = vmul.f32 0.03125, %v53_v26 }
 0x12c   :  { %v57_v28 = vadd.f32 1e-05, %v55_v27 }
 0x12e   :  { %371 = vrsqrt.f32 %v57_v28 }
 0x134   :  { %v370_v29 = vpop.eup %369 }
 0x135   :  { %v60_v30 = vmul.f32 %v370_v29, %v44_v6 }
 0x137   :  { %v69_v33 = vmul.f32 %v299_v31, %v60_v30 }
 0x138   :  { %v372_v32 = vpop.eup %371 }
 0x139   :  { %v61_v34 = vmul.f32 %v372_v32, %v45_v10  ;;  %v78_v37 = vadd.f32 %v300_v35, %v69_v33 }
 0x13b   :  { %v70_v36 = vmul.f32 %v299_v31, %v61_v34 }
 0x13d   :  { %v79_v38 = vadd.f32 %v300_v35, %v70_v36 }
 0x13f   :  { %v80_v39 = vpack.c.bf16 %v79_v38, %v78_v37 }
 0x141   :  { %81 = vst.msk [vmem:[#allocation3] sm:$0xff] %vm34_vm0, %v80_v39 }
 0x148   :  { %v84_v40 = vld [vmem:[#allocation3] sm:$0xff] }
 0x149   :  { %331 = vmatmul.mubr.msk.bf16.vlgmr.msra.gmra.mrb[0].mxu0 %vm34_vm0, %v84_v40 }
 0x21c   :  { %v146_v44 = vpop.f32.mrb[0].mxu0 }
 0x21d   :  { %v147_v45 = vadd.f32 %v301_v43, %v146_v44  ;;  %v332_v46 = vpop.f32.mrb[1].mxu0 }
 0x21e   :  { %v149_v47 = vpop.f32.mrb[2].mxu0 }
 0x21f   :  { %v150_v48 = vadd.f32 %v301_v43, %v149_v47  ;;  %v333_v49 = vpop.f32.mrb[3].mxu0  ;;  %v153_v50 = vmax.f32 %v147_v45, 0.0 }
 0x221   :  { %v154_v51 = vmax.f32 %v150_v48, 0.0 }
 0x223   :  { %v157_v52 = vpack.c.bf16 %v154_v51, %v153_v50 }
 0x225   :  { %351 = vmatmul.mubr.bf16.vlgmr.msra.gmra.mrb[0].mxu1 %v157_v52 }
 0x2f8   :  { %v256_v54 = vpop.f32.mrb[0].mxu1 }
 0x2f9   :  { %v263_v56 = vadd.f32 %v256_v54, %v155_v53  ;;  %v352_v57 = vpop.f32.mrb[1].mxu1 }
 0x2fa   :  { %v259_v58 = vpop.f32.mrb[2].mxu1 }
 0x2fb   :  { %265 = vst.msk [vmem:[#allocation2] sm:$0xff] %vm34_vm0, %v263_v56  ;;  %v264_v59 = vadd.f32 %v259_v58, %v156_v55  ;;  %v353_v60 = vpop.f32.mrb[3].mxu1 }
 0x2fd   :  { %266 = vst.msk [vmem:[#allocation2 + $0x8] sm:$0xff] %vm34_vm0, %v264_v59 }
 0x302   :  { %v270_v62 = vld [vmem:[#allocation2] sm:$0xff] }
 0x303   :  { %v279_v63 = vadd.f32 %v313_v61, %v270_v62 }
 0x304   :  { %v271_v0 = vld [vmem:[#allocation2 + $0x8] sm:$0xff] }
 0x305   :  { %v280_v1 = vadd.f32 %v313_v61, %v271_v0  ;;  %281 = vst.msk [vmem:[#allocation4] sm:$0xff] %vm34_vm0, %v279_v63 }
 0x307   :  { %282 = vst.msk [vmem:[#allocation4 + $0x8] sm:$0xff] %vm34_vm0, %v280_v1 }
 0x308   :  { %384 = shalt.err (!%p381_p4)
}
 0x309   :  { %s385_s30 = scalar_lea.hbm %s521_s7, 256 }
 0x30a   :  { %p386_p5 = scmp.ne.s32.totalorder %s521_s7, %s385_s30  ;;  %p389_p6 = scmp.lt.u32.totalorder %s385_s30, %s521_s7 }
 0x30c   :  { %p391_p7 = pnand %p389_p6, %p386_p5 }
 0x30e   :  { %394 = shalt.err (!%p391_p7)
}
 0x30f   :  { %s400_s12 = smov 128   ;;  %s401_s13 = smov 8  }
 0x310   :  { %294 = dma.vmem_to_hbm [thread:$0]  %s289_s0, 256, %s521_s7, [#allocation5], %s400_s12, %s400_s12, %s401_s13  }
 0x311   :  { %395 = dma.done.wait [#allocation5], 256  }
 0x312   :  { %396 = vsyncadd [#allocation5], 4294967040 }
 0x313   :  { %298 = vsyncpa [#allocation5], 1 }

</bundles_post_ra>
